<compile_context>
chip_gen: v7x
topology: tpu7x:2x2x1
jax: 0.10.0
libtpu: 0.0.40
codegen_flags: <defaults>
</compile_context>

<pallas_src>
import jax
import jax.numpy as jnp
from jax.experimental import pallas as pl
from jax.experimental.pallas import tpu as pltpu

EPS = 1e-9  # MultiClassDiceLoss eps


def _round_up(n, m):
    return ((n + m - 1) // m) * m


def _vmem_budget():
    """Generation-aware (tile-sizing budget, compiler vmem limit) in bytes."""
    try:
        cap = int(pltpu.get_tpu_info().vmem_capacity_bytes)
    except Exception:
        cap = 64 * 1024 * 1024                       # conservative: v7x per-TC VMEM
    limit = min((cap * 3) // 4, 100 * 1024 * 1024)   # ~48 MiB v7x, ~96 MiB v5e/v6e
    budget = (limit * 3) // 4                        # headroom for Pallas internals
    return budget, limit


def _make_kernel(num_classes, hw_tile, acc_w, n_outer, n_inner, tail_valid):
    """tail_valid: number of valid lanes in the globally-last tile, or None if the
    spatial size divides hw_tile exactly (no masking needed anywhere)."""
    n_chunks = hw_tile // acc_w

    def kernel(logits_ref, targets_ref, inter_ref, union_ref):
        # logits_ref:  (C, hw_tile)   HBM dtype (cast to f32 per chunk)
        # targets_ref: (1, hw_tile)   int8 / int32
        # inter_ref:   (C, acc_w)     f32 lane-wise partial sums of probs[target]
        # union_ref:   (C, acc_w)     f32 lane-wise partial sums of probs
        o = pl.program_id(1)
        h = pl.program_id(2)

        @pl.when(h == 0)
        def _init():
            inter_ref[...] = jnp.zeros_like(inter_ref)
            union_ref[...] = jnp.zeros_like(union_ref)

        def body(mask_tail):
            ch = jax.lax.broadcasted_iota(jnp.int32, (num_classes, acc_w), 0)
            if mask_tail:
                lane = jax.lax.broadcasted_iota(jnp.int32, (1, acc_w), 1)
            inter_acc = None
            union_acc = None
            for j in range(n_chunks):               # unrolled; static lane slices
                lo, hi = j * acc_w, (j + 1) * acc_w
                x = logits_ref[:, lo:hi].astype(jnp.float32)     # (C, acc_w)
                t = targets_ref[:, lo:hi].astype(jnp.int32)      # (1, acc_w)

                # numerically stable softmax over channels; one reciprocal / pixel
                m = jnp.max(x, axis=0, keepdims=True)
                e = jnp.exp(x - m)
                s = jnp.sum(e, axis=0, keepdims=True)
                probs = e * pl.reciprocal(s)                     # exact (1e-5 tol)

                if mask_tail:
                    # where-select (not multiply) so garbage tail lanes can't leak
                    probs = jnp.where(lane < (tail_valid - lo), probs, 0.0)

                sel = jnp.where(ch == t, probs, 0.0)             # "onehot * probs"
                inter_acc = sel if inter_acc is None else inter_acc + sel
                union_acc = probs if union_acc is None else union_acc + probs

            inter_ref[...] += inter_acc
            union_ref[...] += union_acc

        if tail_valid is None:
            body(False)                                   # no partial tile anywhere
        elif n_outer == 1 and n_inner == 1:
            body(True)                                    # single (partial) tile
        else:
            is_tail = (o == n_outer - 1) & (h == n_inner - 1)

            @pl.when(jnp.logical_not(is_tail))
            def _hot():
                body(False)                               # unmasked hot path

            @pl.when(is_tail)
            def _tail():
                body(True)                                # masked only on last tile

    return kernel


def multi_class_dice_loss(logits, targets, *, hw_tile=None, acc_w=512, eps=EPS,
                          vmem_budget_bytes=None):
    """logits: (B, C, H, W); targets: (B, H, W) or (B, 1, H, W) int. Scalar loss."""
    B, C, H, W = logits.shape
    HW = H * W
    if targets.ndim == 4:
        targets = targets.reshape(B, H, W)
    targets_flat = targets.reshape(B, HW).astype(jnp.int32)

    # narrow targets stream in HBM (int8 when class ids fit); keep logits dtype
    t_dtype = jnp.int8 if C <= 127 else jnp.int32
    targets_k = targets_flat.reshape(B, 1, HW).astype(t_dtype)
    logits_r = logits.reshape(B, C, HW)

    budget, vmem_limit = _vmem_budget()
    if vmem_budget_bytes is not None:
        budget = int(vmem_budget_bytes)

    acc_w = max(128, _round_up(int(acc_w), 128))
    if hw_tile is None:
        itemsize = jnp.dtype(logits_r.dtype).itemsize
        # per-lane: double-buffered logits + double-buffered targets;
        # fixed: output double-buffers + live per-chunk f32 temporaries.
        per_lane = 2 * C * itemsize + 2 * jnp.dtype(t_dtype).itemsize
        fixed = 10 * C * acc_w * 4
        hw_tile = max(128, (budget - fixed) // per_lane)
        hw_tile = min(hw_tile, 32768)
    hw_tile = max(128, _round_up(int(hw_tile), 128))
    hw_tile = min(hw_tile, _round_up(HW, 128))
    if hw_tile >= acc_w:
        hw_tile = (hw_tile // acc_w) * acc_w     # chunked fold needs divisibility
    else:
        acc_w = hw_tile

    n_tiles = -(-HW // hw_tile)
    # split spatial tiles across an extra "parallel" axis so the 2nd v7x core has
    # work even when B is small; neutral on single-TC chips.
    n_outer = 2 if (n_tiles % 2 == 0 and n_tiles >= 2) else 1
    n_inner = n_tiles // n_outer

    rem = HW - (n_tiles - 1) * hw_tile
    tail_valid = None if rem == hw_tile else rem

    kernel = _make_kernel(C, hw_tile, acc_w, n_outer, n_inner, tail_valid)

    inter_p, union_p = pl.pallas_call(
        kernel,
        out_shape=(jax.ShapeDtypeStruct((B, n_outer, C, acc_w), jnp.float32),
                   jax.ShapeDtypeStruct((B, n_outer, C, acc_w), jnp.float32)),
        grid_spec=pltpu.PrefetchScalarGridSpec(
            num_scalar_prefetch=0,
            grid=(B, n_outer, n_inner),
            in_specs=[
                pl.BlockSpec((pl.Squeezed(), C, hw_tile),
                             lambda b, o, h: (b, 0, o * n_inner + h)),
                pl.BlockSpec((pl.Squeezed(), 1, hw_tile),
                             lambda b, o, h: (b, 0, o * n_inner + h)),
            ],
            out_specs=[
                pl.BlockSpec((pl.Squeezed(), pl.Squeezed(), C, acc_w),
                             lambda b, o, h: (b, o, 0, 0)),
                pl.BlockSpec((pl.Squeezed(), pl.Squeezed(), C, acc_w),
                             lambda b, o, h: (b, o, 0, 0)),
            ],
        ),
        compiler_params=pltpu.CompilerParams(
            dimension_semantics=("parallel", "parallel", "arbitrary"),
            vmem_limit_bytes=int(vmem_limit),
        ),
    )(logits_r, targets_k)

    # tiny final combine in plain JAX: cross-lane reduce + dice ratio + mean.
    inter = 2.0 * jnp.sum(inter_p, axis=(1, 3)) + eps                  # (B, C)
    probs_sum = jnp.sum(union_p, axis=(1, 3))                          # (B, C)
    # per-class pixel counts == sum of one-hot targets (moved out of the hot loop)
    class_ids = jnp.arange(C, dtype=jnp.int32)
    counts = jnp.sum((targets_flat[:, :, None] == class_ids[None, None, :])
                     .astype(jnp.float32), axis=1)                     # (B, C)
    union = probs_sum + counts + eps
    dice_scores = inter / union
    return 1.0 - jnp.mean(dice_scores)


def _reference(logits, targets, eps=EPS):
    """Pure-JAX reference matching the PyTorch MultiClassDiceLoss semantics."""
    B, C, H, W = logits.shape
    probs = jax.nn.softmax(logits.astype(jnp.float32), axis=1)
    onehot = jnp.transpose(
        jax.nn.one_hot(targets.astype(jnp.int32), C, dtype=probs.dtype),
        (0, 3, 1, 2))
    inter = jnp.sum(probs * onehot, axis=(2, 3)) * 2.0 + eps
    union = jnp.sum(probs, axis=(2, 3)) + jnp.sum(onehot, axis=(2, 3)) + eps
    return 1.0 - jnp.mean(inter / union)


if __name__ == "__main__":
    key = jax.random.PRNGKey(0)
    k1, k2, k3, k4, k5, k6, k7, k8 = jax.random.split(key, 8)

    # 1) primary: B=2, C=4, 16x16 -> two 128-lane tiles; exercises the outer
    #    "parallel" HW split and per-(b, o) accumulator init.
    B, C, H, W = 2, 4, 16, 16
    logits = jax.random.normal(k1, (B, C, H, W), dtype=jnp.float32)
    targets = jax.random.randint(k2, (B, H, W), 0, C, dtype=jnp.int32)
    loss = multi_class_dice_loss(logits, targets, hw_tile=128, acc_w=128)
    jax.block_until_ready(loss)
    ref = _reference(logits, targets)
    assert jnp.allclose(loss, ref, rtol=1e-5, atol=1e-5), (loss, ref)

    # 2) chunked fold: 512-lane input tiles accumulated into 128-lane blocks.
    B, C, H, W = 2, 4, 32, 32
    logits = jax.random.normal(k3, (B, C, H, W), dtype=jnp.float32)
    targets = jax.random.randint(k4, (B, H, W), 0, C, dtype=jnp.int32)
    loss = multi_class_dice_loss(logits, targets, hw_tile=512, acc_w=128)
    jax.block_until_ready(loss)
    ref = _reference(logits, targets)
    assert jnp.allclose(loss, ref, rtol=1e-5, atol=1e-5), (loss, ref)

    # 3) ragged spatial size (HW = 130), auto tile sizing, no wrapper-side pad,
    #    tail-lane masking; also exercised under jit.
    B, C, H, W = 2, 3, 10, 13
    logits = jax.random.normal(k5, (B, C, H, W), dtype=jnp.float32)
    targets = jax.random.randint(k6, (B, H, W), 0, C, dtype=jnp.int32)
    loss = jax.jit(multi_class_dice_loss)(logits, targets)
    jax.block_until_ready(loss)
    ref = _reference(logits, targets)
    assert jnp.allclose(loss, ref, rtol=1e-5, atol=1e-5), (loss, ref)

    # 4) accumulator revisit across the inner reduction axis + ragged tail
    #    (HW = 400 -> 4 tiles of 128, 16 valid lanes in the last one), B = 1.
    B, C, H, W = 1, 5, 20, 20
    logits = jax.random.normal(k7, (B, C, H, W), dtype=jnp.float32)
    targets = jax.random.randint(k8, (B, H, W), 0, C, dtype=jnp.int32)
    loss = multi_class_dice_loss(logits, targets, hw_tile=128)
    jax.block_until_ready(loss)
    ref = _reference(logits, targets)
    assert jnp.allclose(loss, ref, rtol=1e-5, atol=1e-5), (loss, ref)

    print("KERNEL_OK")
</pallas_src>

<mosaic_0001>
module attributes {stable_mosaic.version = 11 : i64} {
  func.func @kernel(%arg0: i32, %arg1: i32, %arg2: i32, %arg3: memref<1x4x128xf32, #tpu.memory_space<vmem>>, %arg4: memref<1x1x128xi8, #tpu.memory_space<vmem>>, %arg5: memref<1x1x4x128xf32, #tpu.memory_space<vmem>>, %arg6: memref<1x1x4x128xf32, #tpu.memory_space<vmem>>) attributes {dimension_semantics = [#tpu.dimension_semantics<parallel>, #tpu.dimension_semantics<parallel>, #tpu.dimension_semantics<arbitrary>], iteration_bounds = array<i64: 2, 2, 1>, scalar_prefetch = 0 : i64, scratch_operands = 0 : i64, tpu.core_type = #tpu.core_type<tc>, window_params = [{transform_indices = @transform_0, window_bounds = array<i64: 1, 4, 128>}, {transform_indices = @transform_1, window_bounds = array<i64: 1, 1, 128>}, {transform_indices = @transform_2, window_bounds = array<i64: 1, 1, 4, 128>}, {transform_indices = @transform_3, window_bounds = array<i64: 1, 1, 4, 128>}]} {
    %c0_i32 = arith.constant 0 : i32
    %0 = arith.cmpi eq, %arg2, %c0_i32 : i32
    %1 = arith.extui %0 : i1 to i32
    %c0_i32_0 = arith.constant 0 : i32
    %2 = arith.cmpi ne, %1, %c0_i32_0 : i32
    scf.if %2 {
      %cst_24 = arith.constant 0.000000e+00 : f32
      %35 = vector.broadcast %cst_24 : f32 to vector<4x128xf32>
      %c0_25 = arith.constant 0 : index
      %c0_26 = arith.constant 0 : index
      %c0_27 = arith.constant 0 : index
      %c0_28 = arith.constant 0 : index
      %36 = vector.load %arg5[%c0_25, %c0_26, %c0_27, %c0_28] : memref<1x1x4x128xf32, #tpu.memory_space<vmem>>, vector<1x1x4x128xf32>
      %37 = vector.shape_cast %36 : vector<1x1x4x128xf32> to vector<4x128xf32>
      %38 = vector.shape_cast %35 : vector<4x128xf32> to vector<1x1x4x128xf32>
      tpu.vector_store %arg5[%c0_25, %c0_26, %c0_27, %c0_28], %38 {strides = array<i32>} : memref<1x1x4x128xf32, #tpu.memory_space<vmem>>, vector<1x1x4x128xf32>,
      %cst_29 = arith.constant 0.000000e+00 : f32
      %39 = vector.broadcast %cst_29 : f32 to vector<4x128xf32>
      %c0_30 = arith.constant 0 : index
      %c0_31 = arith.constant 0 : index
      %c0_32 = arith.constant 0 : index
      %c0_33 = arith.constant 0 : index
      %40 = vector.load %arg6[%c0_30, %c0_31, %c0_32, %c0_33] : memref<1x1x4x128xf32, #tpu.memory_space<vmem>>, vector<1x1x4x128xf32>
      %41 = vector.shape_cast %40 : vector<1x1x4x128xf32> to vector<4x128xf32>
      %42 = vector.shape_cast %39 : vector<4x128xf32> to vector<1x1x4x128xf32>
      tpu.vector_store %arg6[%c0_30, %c0_31, %c0_32, %c0_33], %42 {strides = array<i32>} : memref<1x1x4x128xf32, #tpu.memory_space<vmem>>, vector<1x1x4x128xf32>,
    } else {
    }
    %3 = tpu.iota {dimensions = array<i32: 0>} : vector<4x128xi32>
    %c0 = arith.constant 0 : index
    %c0_1 = arith.constant 0 : index
    %c0_2 = arith.constant 0 : index
    %4 = vector.load %arg3[%c0, %c0_1, %c0_2] : memref<1x4x128xf32, #tpu.memory_space<vmem>>, vector<1x4x128xf32>
    %5 = vector.shape_cast %4 : vector<1x4x128xf32> to vector<4x128xf32>
    %c0_3 = arith.constant 0 : index
    %c0_4 = arith.constant 0 : index
    %c0_5 = arith.constant 0 : index
    %6 = vector.load %arg4[%c0_3, %c0_4, %c0_5] : memref<1x1x128xi8, #tpu.memory_space<vmem>>, vector<1x1x128xi8>
    %7 = vector.shape_cast %6 : vector<1x1x128xi8> to vector<1x128xi8>
    %8 = arith.extsi %7 : vector<1x128xi8> to vector<1x128xi32>
    %cst = arith.constant dense<0xFF800000> : vector<128xf32>
    %9 = vector.multi_reduction <maximumf>, %5, %cst [0] : vector<4x128xf32> to vector<128xf32>
    %10 = vector.shape_cast %9 : vector<128xf32> to vector<1x128xf32>
    %11 = vector.broadcast %10 : vector<1x128xf32> to vector<4x128xf32>
    %12 = arith.subf %5, %11 : vector<4x128xf32>
    %13 = math.exp %12 : vector<4x128xf32>
    %cst_6 = arith.constant dense<0.000000e+00> : vector<128xf32>
    %14 = vector.multi_reduction <add>, %13, %cst_6 [0] : vector<4x128xf32> to vector<128xf32>
    %15 = vector.shape_cast %14 : vector<128xf32> to vector<1x128xf32>
    %16 = tpu.reciprocal %15 : vector<1x128xf32> -> vector<1x128xf32>
    %17 = vector.broadcast %16 : vector<1x128xf32> to vector<4x128xf32>
    %18 = arith.mulf %13, %17 : vector<4x128xf32>
    %19 = vector.broadcast %8 : vector<1x128xi32> to vector<4x128xi32>
    %20 = arith.cmpi eq, %3, %19 : vector<4x128xi32>
    %cst_7 = arith.constant 0.000000e+00 : f32
    %21 = vector.broadcast %cst_7 : f32 to vector<4x128xf32>
    %22 = arith.select %20, %18, %21 : vector<4x128xi1>, vector<4x128xf32>
    %c0_8 = arith.constant 0 : index
    %c0_9 = arith.constant 0 : index
    %c0_10 = arith.constant 0 : index
    %c0_11 = arith.constant 0 : index
    %23 = vector.load %arg5[%c0_8, %c0_9, %c0_10, %c0_11] : memref<1x1x4x128xf32, #tpu.memory_space<vmem>>, vector<1x1x4x128xf32>
    %24 = vector.shape_cast %23 : vector<1x1x4x128xf32> to vector<4x128xf32>
    %25 = arith.addf %24, %22 : vector<4x128xf32>
    %c0_12 = arith.constant 0 : index
    %c0_13 = arith.constant 0 : index
    %c0_14 = arith.constant 0 : index
    %c0_15 = arith.constant 0 : index
    %26 = vector.load %arg5[%c0_12, %c0_13, %c0_14, %c0_15] : memref<1x1x4x128xf32, #tpu.memory_space<vmem>>, vector<1x1x4x128xf32>
    %27 = vector.shape_cast %26 : vector<1x1x4x128xf32> to vector<4x128xf32>
    %28 = vector.shape_cast %25 : vector<4x128xf32> to vector<1x1x4x128xf32>
    tpu.vector_store %arg5[%c0_12, %c0_13, %c0_14, %c0_15], %28 {strides = array<i32>} : memref<1x1x4x128xf32, #tpu.memory_space<vmem>>, vector<1x1x4x128xf32>,
    %c0_16 = arith.constant 0 : index
    %c0_17 = arith.constant 0 : index
    %c0_18 = arith.constant 0 : index
    %c0_19 = arith.constant 0 : index
    %29 = vector.load %arg6[%c0_16, %c0_17, %c0_18, %c0_19] : memref<1x1x4x128xf32, #tpu.memory_space<vmem>>, vector<1x1x4x128xf32>
    %30 = vector.shape_cast %29 : vector<1x1x4x128xf32> to vector<4x128xf32>
    %31 = arith.addf %30, %18 : vector<4x128xf32>
    %c0_20 = arith.constant 0 : index
    %c0_21 = arith.constant 0 : index
    %c0_22 = arith.constant 0 : index
    %c0_23 = arith.constant 0 : index
    %32 = vector.load %arg6[%c0_20, %c0_21, %c0_22, %c0_23] : memref<1x1x4x128xf32, #tpu.memory_space<vmem>>, vector<1x1x4x128xf32>
    %33 = vector.shape_cast %32 : vector<1x1x4x128xf32> to vector<4x128xf32>
    %34 = vector.shape_cast %31 : vector<4x128xf32> to vector<1x1x4x128xf32>
    tpu.vector_store %arg6[%c0_20, %c0_21, %c0_22, %c0_23], %34 {strides = array<i32>} : memref<1x1x4x128xf32, #tpu.memory_space<vmem>>, vector<1x1x4x128xf32>,
    return
  }
  func.func @transform_0(%arg0: i32, %arg1: i32, %arg2: i32) -> (i32, i32, i32) {
    %c1_i32 = arith.constant 1 : i32
    %0 = arith.muli %arg1, %c1_i32 : i32
    %1 = arith.addi %0, %arg2 : i32
    %c0_i32 = arith.constant 0 : i32
    %c0_i32_0 = arith.constant 0 : i32
    return %arg0, %c0_i32, %1 : i32, i32, i32
  }
  func.func @transform_1(%arg0: i32, %arg1: i32, %arg2: i32) -> (i32, i32, i32) {
    %c1_i32 = arith.constant 1 : i32
    %0 = arith.muli %arg1, %c1_i32 : i32
    %1 = arith.addi %0, %arg2 : i32
    %c0_i32 = arith.constant 0 : i32
    %c0_i32_0 = arith.constant 0 : i32
    return %arg0, %c0_i32, %1 : i32, i32, i32
  }
  func.func @transform_2(%arg0: i32, %arg1: i32, %arg2: i32) -> (i32, i32, i32, i32) {
    %c0_i32 = arith.constant 0 : i32
    %c0_i32_0 = arith.constant 0 : i32
    %c0_i32_1 = arith.constant 0 : i32
    return %arg0, %arg1, %c0_i32, %c0_i32_0 : i32, i32, i32, i32
  }
  func.func @transform_3(%arg0: i32, %arg1: i32, %arg2: i32) -> (i32, i32, i32, i32) {
    %c0_i32 = arith.constant 0 : i32
    %c0_i32_0 = arith.constant 0 : i32
    %c0_i32_1 = arith.constant 0 : i32
    return %arg0, %arg1, %c0_i32, %c0_i32_0 : i32, i32, i32, i32
  }
}

</mosaic_0001>

<bundles_post_ra>
// kernel: tpu_custom_call.1
= control target key start
LH: loop header
LB: loop body
LE: loop exit
PB: predicated region body
PF: predicated region fallthrough
CT: control target
= control target key end

     0   :  { %9 = vsyncpa [#allocation3], 0  ;;  %s1018_s0 = inlined_call_operand.hbm [shape: f32[2,4,256], index: 0, kind: input, shape index: {}]   ;;  %s1019_s1 = inlined_call_operand.vmem [shape: s8[2,1,256], index: 1, kind: input, shape index: {}]   ;;  %s1020_s2 = inlined_call_operand.hbm [shape: f32[2,2,4,128], index: 2, kind: output, shape index: {0}]   ;;  %s1021_s3 = inlined_call_operand.hbm [shape: f32[2,2,4,128], index: 3, kind: output, shape index: {1}]  }
   0x1   :  { %11 = vsyncpa [#allocation3 + $0x1], 0 }
   0x2   :  { %12 = vsyncpa [#allocation4], 0 }
   0x3   :  { %14 = vsyncpa [#allocation4 + $0x1], 0 }
   0x4   :  { %15 = vsyncpa [#allocation7], 0 }
   0x5   :  { %17 = vsyncpa [#allocation7 + $0x1], 0  ;;  %s774_s12 = smov 0   ;;  %s776_s13 = smov 0  }
   0x6   :  { %s778_s14 = smov 0   ;;  %s780_s15 = smov 0  }
   0x7   :  { %s782_s16 = smov 0   ;;  %s784_s17 = smov 0  }
   0x8   :  { %s786_s18 = smov 0   ;;  %s788_s19 = smov 0  }
   0x9 LB: > { %s480_s20 = sadd.s32 4294967295, %s748_s19   ;;  %s481_s21 = sadd.s32 4294967294, %s748_s19   ;;  %s748_s19 = sphi %s788_s19, %s23_s19   ;;  %s744_s18 = sphi %s786_s18, %s1038_s18   ;;  %s740_s17 = sphi %s784_s17, %s1037_s17   ;;  %s736_s16 = sphi %s782_s16, %s1036_s16   ;;  %s732_s15 = sphi %s780_s15, %s1035_s15   ;;  %s728_s14 = sphi %s778_s14, %s1034_s14   ;;  %s724_s13 = sphi %s776_s13, %s1033_s13   ;;  %s720_s12 = sphi %s774_s12, %s1032_s12  }
   0xa   : > { %s38_s22 = sadd.s32 1, %s740_s17  ;;  %s42_s23 = sadd.s32 1, %s744_s18 }
   0xb   : > { %p40_p0 = scmp.ge.s32.totalorder %s38_s22, 2  ;;  %s53_s24 = sadd.s32 1, %s728_s14 }
   0xc   : > { %p60_p1 = scmp.ne.s32.totalorder %s728_s14, %s724_s13  ;;  %p61_p2 = scmp.eq.s32.totalorder %s748_s19, 0 }
   0xd   : > { %s1040_s22 = smov (%p40_p0, %s38_s22), 0  ;;  %s1042_s23 = smov (!%p40_p0, %s42_s23), %s744_s18 }
   0xe   : > { %s49_s25 = ssub.s32 %s740_s17, %s1040_s22  ;;  %p827_p3 = por %p61_p2, %p60_p1 }
   0xf   : > { %p44_p4 = scmp.ge.s32.totalorder %s1042_s23, 2  ;;  %p66_p5 = scmp.ne.s32.totalorder %s724_s13, %s720_s12 }
  0x10   : > { %p67_p6 = scmp.eq.s32.totalorder %s480_s20, 0  ;;  %p122_p7 = scmp.eq.s32.totalorder %s480_s20, 3 }
  0x11   : > { %s1044_s23 = smov (%p44_p4, %s1042_s23), 0  ;;  %p128_p10 = scmp.eq.s32.totalorder %s481_s21, 3 }
  0x12   : > { %p835_p8 = por %p67_p6, %p66_p5  ;;  %p839_p9 = por %p122_p7, %p60_p1 }
  0x13   : > { %s48_s29 = ssub.s32 %s744_s18, %s1044_s23  ;;  %p845_p12 = por %p128_p10, %p66_p5 }
  0x14   : > { %s1025_s28 = scalar_select %p839_p9, 1, 0 }
  0x15   : > { %s50_s30 = sor.u32 %s49_s25, %s48_s29  ;;  %p517_p13 = scmp.lt.s32.totalorder %s748_s19, 4 }
  0x16   : > { %p51_p11 = scmp.eq.s32.totalorder %s50_s30, 0  ;;  %s176_s5 = sand.u32 1, %s728_s14  }
  0x17   : > { %s1026_s4 = scalar_select %p845_p12, 1, 0 }
  0x18   : > { %s852_s6 = scalar_select %p51_p11, %s728_s14, %s53_s24  }
  0x19   : > { %s484_s7 = sshll.u32 %s176_s5, 2  ;;  %s485_s8 = sshll.u32 %s744_s18, 1 }
  0x1a   : > { %s186_s9 = sadd.s32 %s740_s17, %s485_s8  ;;  %s180_s10 = scalar_lea.vmem [#allocation2], %s484_s7 }
  0x1b   : > { %s190_s11 = sshll.u32 %s180_s10, 4  ;;  %s486_s20 = sshll.u32 %s186_s9, 6  ;;  %s856_s11 = int_to_ptr.vmem [resolvable:$true] %s190_s11 }
  0x1c   : > { %s861_s29 = scalar_lea.hbm %s1018_s0, %s486_s20  ;;  %p865_p0 = pnand %p517_p13, %p827_p3 }
  0x1d   : > { %s177_s30 = scalar_lea.sflag [#allocation3], %s176_s5  ;;  %s588_s7 = scalar_lea.hbm %s861_s29, 64 }
  0x1e   : > { %p589_p4 = scmp.ne.s32.totalorder %s861_s29, %s588_s7  ;;  %p590_p5 = pneg %p865_p0 }
  0x1f   : > { %s593_s9 = scalar_lea.hbm %s1018_s0, 256  ;;  %p594_p3 = scmp.lt.u32.totalorder %s861_s29, %s1018_s0 }
  0x20   : > { %p591_p6 = pnand %p590_p5, %p589_p4  ;;  %p595_p10 = scmp.lt.u32.totalorder %s593_s9, %s588_s7 }
  0x21   : > { %p597_p13 = scmp.lt.u32.totalorder %s588_s7, %s861_s29 }
  0x22   : > { %p592_p7 = pneg %p591_p6  ;;  %p596_p11 = por %p595_p10, %p594_p3 }
  0x24   : > { %p598_p1 = por %p597_p13, %p596_p11 }
  0x26   : > { %p599_p2 = pnand %p598_p1, %p592_p7 }
  0x28   : > { %602 = shalt.err (!%p599_p2)
}
  0x29   : > { %s603_s5 = scalar_lea.vmem %s856_s11, 64  ;;  %s750_s21 = smov [#allocation2]  }
  0x2a   : > { %p604_p4 = scmp.ne.s32.totalorder %s856_s11, %s603_s5  ;;  %s608_s25 = sshll.u32 %s750_s21, 4  ;;  %s609_s25 = int_to_ptr.vmem [resolvable:$false] %s608_s25 }
  0x2b   : > { %s610_s26 = scalar_lea.vmem %s609_s25, 128  ;;  %p611_p9 = scmp.lt.s32.totalorder %s856_s11, %s609_s25 }
  0x2c   : > { %p606_p6 = pnand %p604_p4, %p590_p5  ;;  %p612_p3 = scmp.lt.s32.totalorder %s610_s26, %s603_s5 }
  0x2e   : > { %p607_p12 = pneg %p606_p6  ;;  %p613_p10 = por %p612_p3, %p611_p9 }
  0x30   : > { %p614_p11 = pnand %p613_p10, %p607_p12 }
  0x32   : > { %617 = shalt.err (!%p614_p11)
}
  0x33   : > { %509 = dma.hbm_to_vmem [thread:$0]  (!%p865_p0), %s861_s29, 64, %s856_s11, %s177_s30  }
  0x34   : > { %p1028_p1 = scmp.lt.s32.totalorder %s748_s19, 5  ;;  %p1029_p2 = scmp.ge.s32.totalorder %s748_s19, 1 }
  0x36   : > { %p208_p5 = pnand %p1029_p2, %p1028_p1 }
  0x37   : > { %s901_s7 = sand.u32 (!%p208_p5), 1, %s724_s13  }
  0x38   : > { %211 = sbr.rel (%p208_p5) target bundleno = 160 (0xa0), region = 28  ;;  %s488_s8 = sshll.u32 (!%p208_p5), %s901_s7, 2 }
  0x39   : > { %s214_s9 = scalar_lea.sflag (!%p208_p5), [#allocation3], %s901_s7  ;;  %s217_s10 = scalar_lea.vmem (!%p208_p5), [#allocation2], %s488_s8 }
  0x3f   : > { %707 = dma.done.wait (%p835_p8), %s214_s9, 64  }
  0x40   : > { %709 = vsyncadd (%p835_p8), %s214_s9, 4294967232  ;;  %s909_s24 = scalar_lea.vmem [#allocation5], %s488_s8  ;;  %v751_v0 = vmov 0.0   ;;  %s912_s11 = scalar_lea.vmem [#allocation6], %s488_s8  ;;  %vm274_vm0 = vcmask 1043456   ;;  %v269_v16 = vlaneseq }
  0x41   : > { %267 = vst [vmem:[%s909_s24] sm:$0xf] %v751_v0  ;;  %268 = vst [vmem:[%s912_s11] sm:$0xf] %v751_v0  ;;  %v271_v1 = vld [vmem:[%s217_s10] sm:$0xf]  ;;  %p255_p8 = scmp.lt.s32.totalorder %s736_s16, 1  ;;  %p257_p9 = scmp.lt.s32.totalorder %s732_s15, 1 }
  0x42   : > { %v275_v2 = vsel %vm274_vm0, %v271_v1, -inf  ;;  %v270_v19 = vshrl.u32 %v269_v16, 7  ;;  %s494_s26 = sshll.u32 %s736_s16, 1  ;;  %s342_s10 = sshll.u32 %s912_s11, 4  ;;  %s935_s10 = int_to_ptr.vmem [resolvable:$true] %s342_s10 }
  0x43   : > { %v276_v3 = vrot.slane %v275_v2, 4  ;;  %s256_s27 = scalar_select %p255_p8, %s736_s16, 1 }
  0x44   : > { %s258_s29 = scalar_select %p257_p9, %s732_s15, 1  ;;  %v296_v23 = vsub.s32 0, %v270_v19 }
  0x45   : > { %v277_v4 = vmax.f32 %v275_v2, %v276_v3  ;;  %s491_s30 = sshll.u32 %s256_s27, 1  ;;  %s323_s8 = sadd.s32 %s732_s15, %s494_s26 }
  0x46   : > { %s260_s20 = sadd.s32 %s491_s30, %s258_s29  ;;  %s495_s9 = sshll.u32 %s323_s8, 6 }
  0x47   : > { %v278_v5 = vrot.slane %v277_v4, 2  ;;  %s261_s25 = scalar_lea.vmem %s1019_s1, %s260_s20  ;;  %s327_s27 = sshll.u32 %s909_s24, 4  ;;  %s942_s27 = int_to_ptr.vmem [resolvable:$true] %s327_s27 }
  0x48   : > { %v272_v21 = vld [vmem:[%s261_s25] sm:$0x1]  ;;  %v303_v26 = vld [vmem:[%s912_s11] sm:$0xf]  ;;  %v300_v28 = vld [vmem:[%s909_s24] sm:$0xf]  ;;  %s933_s20 = scalar_lea.hbm %s1021_s3, %s495_s9  ;;  %s940_s5 = scalar_lea.hbm %s1020_s2, %s495_s9 }
  0x49   : > { %v279_v6 = vmax.f32 %v277_v4, %v278_v5  ;;  %v273_v22 = vunpack.c.0.s8 %v272_v21  ;;  %s312_s21 = scalar_lea.sflag [#allocation7], %s901_s7  ;;  %s618_s25 = scalar_lea.vmem %s935_s10, 64 }
  0x4a   : > { %p619_p12 = scmp.ne.s32.totalorder %s935_s10, %s618_s25  ;;  %p1030_p0 = scmp.ne.s32.totalorder %s1025_s28, 0 }
  0x4b   : > { %v280_v7 = vrot.slane %v279_v6, 1  ;;  %v297_v24 = vrot.slane %v273_v22, %v296_v23  ;;  %s752_s26 = smov [#allocation6]  }
  0x4c   : > { %p620_p7 = pnand %p619_p12, %p1030_p0  ;;  %s622_s8 = sshll.u32 %s752_s26, 4  ;;  %s623_s8 = int_to_ptr.vmem [resolvable:$false] %s622_s8 }
  0x4d   : > { %v281_v8 = vmax.f32 %v279_v6, %v280_v7  ;;  %vm298_vm1 = vcmp.eq.s32.totalorder %v270_v19, %v297_v24  ;;  %s624_s29 = scalar_lea.vmem %s623_s8, 128  ;;  %p625_p4 = scmp.lt.s32.totalorder %s935_s10, %s623_s8 }
  0x4e   : > { %p621_p13 = pneg %p620_p7  ;;  %p626_p6 = scmp.lt.s32.totalorder %s624_s29, %s618_s25 }
  0x4f   : > { %v282_v9 = vsub.f32 %v271_v1, %v281_v8 }
  0x50   : > { %p627_p3 = por %p626_p6, %p625_p4 }
  0x51   : > { %v283_v10 = vmul.f32 1.442695, %v282_v9 }
  0x52   : > { %p628_p10 = pnand %p627_p3, %p621_p13 }
  0x53   : > { %584 = vpow2.f32 %v283_v10 }
  0x5d   : > { %v585_v11 = vpop.eup %584 }
  0x5e   : > { %v285_v12 = vsel %vm274_vm0, %v585_v11, 0.0 }
  0x5f   : > { %v286_v13 = vrot.slane %v285_v12, 4 }
  0x61   : > { %v287_v14 = vadd.f32 %v286_v13, %v285_v12 }
  0x63   : > { %v288_v15 = vrot.slane %v287_v14, 2 }
  0x65   : > { %v289_v17 = vadd.f32 %v288_v15, %v287_v14 }
  0x67   : > { %v290_v18 = vrot.slane %v289_v17, 1 }
  0x69   : > { %v291_v20 = vadd.f32 %v290_v18, %v289_v17 }
  0x6b   : > { %586 = vrcp.f32 %v291_v20 }
  0x75   : > { %v587_v25 = vpop.eup %586 }
  0x76   : > { %v293_v27 = vmul.f32 %v587_v25, %v585_v11 }
  0x78   : > { %v299_v29 = vsel %vm298_vm1, %v293_v27, 0.0  ;;  %v304_v30 = vadd.f32 %v303_v26, %v293_v27 }
  0x79   : > { %v301_v31 = vadd.f32 %v300_v28, %v299_v29 }
  0x7a   : > { %305 = vst [vmem:[%s912_s11] sm:$0xf] %v304_v30 }
  0x7b   : > { %302 = vst [vmem:[%s909_s24] sm:$0xf] %v301_v31 }
  0x7c   : > { %631 = shalt.err (!%p628_p10)
}
  0x7d   : > { %s632_s24 = scalar_lea.hbm %s933_s20, 64  ;;  %s636_s30 = scalar_lea.hbm %s1021_s3, 256 }
  0x7e   : > { %p633_p11 = scmp.ne.s32.totalorder %s933_s20, %s632_s24  ;;  %p637_p5 = scmp.lt.u32.totalorder %s933_s20, %s1021_s3 }
  0x7f   : > { %p638_p8 = scmp.lt.u32.totalorder %s636_s30, %s632_s24  ;;  %p640_p12 = scmp.lt.u32.totalorder %s632_s24, %s933_s20 }
  0x80   : > { %p634_p1 = pnand %p633_p11, %p1030_p0 }
  0x81   : > { %p639_p9 = por %p638_p8, %p637_p5 }
  0x82   : > { %p635_p2 = pneg %p634_p1 }
  0x83   : > { %p641_p7 = por %p640_p12, %p639_p9 }
  0x85   : > { %p642_p13 = pnand %p641_p7, %p635_p2 }
  0x87   : > { %645 = shalt.err (!%p642_p13)
}
  0x88   : > { %503 = dma.vmem_to_hbm [thread:$0]  (%p1030_p0), %s935_s10, 64, %s933_s20, %s312_s21  }
  0x89   : > { %s307_s25 = scalar_lea.sflag [#allocation4], %s901_s7  ;;  %s646_s26 = scalar_lea.vmem %s942_s27, 64 }
  0x8a   : > { %p647_p4 = scmp.ne.s32.totalorder %s942_s27, %s646_s26  ;;  %s753_s8 = smov [#allocation5]  }
  0x8b   : > { %s650_s29 = sshll.u32 %s753_s8, 4  ;;  %s651_s29 = int_to_ptr.vmem [resolvable:$false] %s650_s29 }
  0x8c   : > { %p648_p6 = pnand %p647_p4, %p1030_p0  ;;  %s652_s24 = scalar_lea.vmem %s651_s29, 128 }
  0x8d   : > { %p653_p10 = scmp.lt.s32.totalorder %s942_s27, %s651_s29  ;;  %p654_p11 = scmp.lt.s32.totalorder %s652_s24, %s646_s26 }
  0x8e   : > { %p649_p3 = pneg %p648_p6 }
  0x8f   : > { %p655_p1 = por %p654_p11, %p653_p10 }
  0x91   : > { %p656_p2 = pnand %p655_p1, %p649_p3 }
  0x93   : > { %659 = shalt.err (!%p656_p2)
}
  0x94   : > { %s660_s7 = scalar_lea.hbm %s940_s5, 64  ;;  %s664_s21 = scalar_lea.hbm %s1020_s2, 256 }
  0x95   : > { %p661_p5 = scmp.ne.s32.totalorder %s940_s5, %s660_s7  ;;  %p665_p12 = scmp.lt.u32.totalorder %s940_s5, %s1020_s2 }
  0x96   : > { %p666_p7 = scmp.lt.u32.totalorder %s664_s21, %s660_s7  ;;  %p668_p4 = scmp.lt.u32.totalorder %s660_s7, %s940_s5 }
  0x97   : > { %p662_p8 = pnand %p661_p5, %p1030_p0 }
  0x98   : > { %p667_p13 = por %p666_p7, %p665_p12 }
  0x99   : > { %p663_p9 = pneg %p662_p8 }
  0x9a   : > { %p669_p6 = por %p668_p4, %p667_p13 }
  0x9c   : > { %p670_p3 = pnand %p669_p6, %p663_p9 }
  0x9e   : > { %673 = shalt.err (!%p670_p3)
}
  0x9f   : > { %502 = dma.vmem_to_hbm [thread:$0]  (%p1030_p0), %s942_s27, 64, %s940_s5, %s307_s25  }
  0xa0 PF: > { %p518_p10 = scmp.ge.s32.totalorder %s748_s19, 2  ;;  %s354_s30 = sand.u32 1, %s720_s12  }
  0xa1   : > { %p1031_p11 = scmp.ne.s32.totalorder %s1026_s4, 0  ;;  %s355_s15 = scalar_lea.sflag [#allocation4], %s354_s30 }
  0xa3   : > { %p511_p1 = pnand %p518_p10, %p1031_p11 }
  0xa5   : > { %711 = dma.done.wait (!%p511_p1), %s355_s15, 64  }
  0xa6   : > { %713 = vsyncadd (!%p511_p1), %s355_s15, 4294967232  ;;  %s364_s16 = scalar_lea.sflag [#allocation7], %s354_s30 }
  0xa7   : > { %715 = dma.done.wait (!%p511_p1), %s364_s16, 64  }
  0xa8   : > { %717 = vsyncadd (!%p511_p1), %s364_s16, 4294967232  ;;  %s23_s19 = sadd.s32 1, %s748_s19   ;;  %s1032_s12 = smov %s724_s13 }
  0xa9   : > { %p20_p2 = scmp.ge.s32.totalorder %s23_s19, 6   ;;  %s1033_s13 = smov %s728_s14 }
  0xaa   : > { %s1034_s14 = smov %s852_s6  ;;  %s1035_s15 = smov %s740_s17 }
  0xab   : > { %s1036_s16 = smov %s744_s18  ;;  %s1037_s17 = smov %s1040_s22 }
  0xac   : > { %s1038_s18 = smov %s1044_s23  ;;  %22 = sbr.rel (!%p20_p2) target bundleno = 9 (0x9), region = 97 }
  0xb3   :  { %369 = vsyncpa [#allocation3], 1 }
  0xb4   :  { %371 = vsyncpa [#allocation3 + $0x1], 1 }
  0xb5   :  { %372 = vsyncpa [#allocation4], 1 }
  0xb6   :  { %374 = vsyncpa [#allocation4 + $0x1], 1 }
  0xb7   :  { %375 = vsyncpa [#allocation7], 1 }
  0xb8   :  { %377 = vsyncpa [#allocation7 + $0x1], 1 }

</bundles_post_ra>
